<compile_context>
chip_gen: v6e
topology: v6e:2x2x1
jax: 0.10.0
libtpu: 0.0.40
codegen_flags: <defaults>
</compile_context>

<pallas_src>
import functools

import jax
import jax.numpy as jnp
from jax import lax
from jax.experimental import pallas as pl
from jax.experimental.pallas import tpu as pltpu


def _round_up(x, m):
    return ((x + m - 1) // m) * m


# ---------------------------------------------------------------------------
# Path 1: small vocab — one-hot MXU matmul against a VMEM-resident table.
# ---------------------------------------------------------------------------
def _onehot_embed_kernel(ids_ref, table_ref, out_ref):
    """out[t, :] = table[ids[t], :] via a one-hot matmul on the MXU.

    ids_ref:   (tok_block, 1) int32, per-step block of token ids (VMEM)
    table_ref: (V, D) embedding table, whole array resident in VMEM
    out_ref:   (tok_block, D) output tile for this grid step
    """
    tok_block = out_ref.shape[0]
    vocab = table_ref.shape[0]
    # one_hot[t, v] = (ids[t] == v): 2-D iota + lane broadcast, then the whole
    # gather is a single (tok_block, V) @ (V, D) MXU matmul — no dynamic
    # sublane loads, no XLU row packing.
    vocab_iota = lax.broadcasted_iota(jnp.int32, (tok_block, vocab), 1)
    one_hot = (ids_ref[...] == vocab_iota).astype(table_ref.dtype)
    out = jnp.dot(one_hot, table_ref[...], preferred_element_type=jnp.float32)
    out_ref[...] = out.astype(out_ref.dtype)


def _onehot_lookup(flat_ids, weight, tok_block, vmem_limit_bytes):
    n_pad = flat_ids.shape[0]
    _, d = weight.shape
    return pl.pallas_call(
        _onehot_embed_kernel,
        out_shape=jax.ShapeDtypeStruct((n_pad, d), weight.dtype),
        grid=(n_pad // tok_block,),
        in_specs=[
            # Per-step id block; avoids staging the whole id vector anywhere.
            pl.BlockSpec((tok_block, 1), lambda i: (i, 0)),
            # Whole table, untiled, single VMEM buffer (no double-buffering).
            pl.BlockSpec(memory_space=pltpu.MemorySpace.VMEM),
        ],
        out_specs=pl.BlockSpec((tok_block, d), lambda i: (i, 0)),
        compiler_params=pltpu.CompilerParams(
            dimension_semantics=("parallel",),  # v7x megacore splits token blocks
            vmem_limit_bytes=vmem_limit_bytes),
    )(flat_ids.reshape(n_pad, 1), weight)


# ---------------------------------------------------------------------------
# Path 2: large vocab — table stays in HBM, rows gathered with async DMA.
# ---------------------------------------------------------------------------
_DMA_INFLIGHT = 8                      # row DMAs kept in flight per wave
_MAX_TOKENS_PER_GATHER_CALL = 32768    # bounds the SMEM-resident id chunk (128 KiB)


def _gather_embed_kernel(ids_ref, table_ref, out_ref, sems, *, tok_block):
    """DMA row gather: HBM table rows -> HBM output rows (no VMEM staging).

    ids_ref:   (n_chunk,) int32 token ids, resident in SMEM
    table_ref: (V, D) embedding table, left in HBM (memory_space=pl.ANY)
    out_ref:   (n_chunk, D) output in HBM (memory_space=pl.ANY), written by DMA
    sems:      (_DMA_INFLIGHT,) DMA completion semaphores
    """
    base = pl.program_id(0) * tok_block

    def row_copy(j, slot):
        row = base + j
        return pltpu.make_async_copy(
            table_ref.at[pl.ds(ids_ref[row], 1), :],
            out_ref.at[pl.ds(row, 1), :],
            sems.at[slot])

    def wave(w, carry):
        off = w * _DMA_INFLIGHT
        for s in range(_DMA_INFLIGHT):   # issue a wave of row DMAs
            row_copy(off + s, s).start()
        for s in range(_DMA_INFLIGHT):   # drain the wave
            row_copy(off + s, s).wait()
        return carry

    lax.fori_loop(0, tok_block // _DMA_INFLIGHT, wave, 0)


def _gather_lookup_call(ids_chunk, weight, tok_block):
    n_chunk = ids_chunk.shape[0]
    _, d = weight.shape
    kernel = functools.partial(_gather_embed_kernel, tok_block=tok_block)
    return pl.pallas_call(
        kernel,
        out_shape=jax.ShapeDtypeStruct((n_chunk, d), weight.dtype),
        grid=(n_chunk // tok_block,),
        in_specs=[
            pl.BlockSpec(memory_space=pltpu.MemorySpace.SMEM),  # id chunk in SMEM
            pl.BlockSpec(memory_space=pl.ANY),                  # table stays in HBM
        ],
        out_specs=pl.BlockSpec(memory_space=pl.ANY),            # rows written via DMA
        scratch_shapes=[pltpu.SemaphoreType.DMA((_DMA_INFLIGHT,))],
        compiler_params=pltpu.CompilerParams(
            # Pure DMA orchestration (HBM-BW / descriptor bound); kept sequential.
            dimension_semantics=("arbitrary",)),
    )(ids_chunk, weight)


# ---------------------------------------------------------------------------
# Wrapper (= nn.Embedding.forward).
# ---------------------------------------------------------------------------
def embedding_lookup(token_ids, weight, *, tok_block=256,
                     onehot_max_vocab=2048, vmem_budget_bytes=48 << 20):
    """nn.Embedding forward: weight[token_ids].

    token_ids: integer array of any shape; weight: (vocab_size, embed_dim).
    Returns token_ids.shape + (embed_dim,).
    """
    orig_shape = token_ids.shape
    flat = token_ids.reshape(-1).astype(jnp.int32)
    n = flat.shape[0]
    v, d = weight.shape
    itemsize = jnp.dtype(weight.dtype).itemsize

    # Token-axis tile: large (256) for real workloads so each grid step moves a
    # 128+ KiB lane-dense tile; shrunk (to a multiple of 8) only when the batch
    # itself is tiny.  Keep >=2 grid steps when possible so "parallel" has
    # something to split across the two v7x TensorCores.
    tb = max(8, min(_round_up(tok_block, 8), _round_up(n, 8)))
    n_pad = _round_up(n, tb)
    while n_pad // tb < 2 and tb > 8:
        tb = _round_up(tb // 2, 8)
        n_pad = _round_up(n, tb)

    if n_pad != n:
        # Tail padding uses id 0 (always a valid row); padded rows are sliced off.
        flat = jnp.concatenate([flat, jnp.zeros((n_pad - n,), jnp.int32)])

    # TODO(synk): out-of-range / negative ids are not checked (PyTorch raises);
    # a bad id silently gathers other rows.  Add pl.debug_check under a flag.

    # VMEM need of the resident-table one-hot path: table (single buffer) +
    # double-buffered output tiles + one-hot intermediate + headroom.
    # Budgeted for v7x (64 MiB physical); v5e/v6e have more, so this is safe
    # on every generation.  The default scoped VMEM limit is raised explicitly.
    table_bytes = v * d * itemsize
    out_tile_bytes = tb * d * itemsize
    onehot_bytes = tb * _round_up(v, 128) * 4
    vmem_need = table_bytes + 2 * out_tile_bytes + 2 * onehot_bytes + (4 << 20)

    use_onehot = (v <= onehot_max_vocab) and (vmem_need <= vmem_budget_bytes)

    if use_onehot:
        out = _onehot_lookup(flat, weight, tb, int(vmem_need))
    else:
        # Large vocab: table stays in HBM; gather rows with async DMA.  Ids are
        # chunked so the SMEM-resident id vector stays small for any batch size.
        max_call = max(tb, (_MAX_TOKENS_PER_GATHER_CALL // tb) * tb)
        parts = [_gather_lookup_call(flat[s:s + max_call], weight, tb)
                 for s in range(0, n_pad, max_call)]
        out = parts[0] if len(parts) == 1 else jnp.concatenate(parts, axis=0)

    return out[:n].reshape(*orig_shape, d)


if __name__ == "__main__":
    VOCAB, EMBED_DIM, PADDING_IDX = 64, 128, 0
    B, L = 2, 8

    key = jax.random.PRNGKey(0)
    k_w, k_ids = jax.random.split(key)

    # nn.Embedding init: N(0, 1) with the padding row zeroed.
    weight = jax.random.normal(k_w, (VOCAB, EMBED_DIM), jnp.float32)
    weight = weight.at[PADDING_IDX].set(0.0)

    token_ids = jax.random.randint(k_ids, (B, L), 0, VOCAB, jnp.int32)
    token_ids = token_ids.at[0, 0].set(PADDING_IDX)    # exercise the padding row

    ref = jnp.take(weight, token_ids, axis=0)           # pure-JAX reference

    # Small-vocab fast path (one-hot MXU matmul, VMEM-resident table).
    out = embedding_lookup(token_ids, weight)
    jax.block_until_ready(out)
    assert out.shape == (B, L, EMBED_DIM)
    assert bool(jnp.allclose(out, ref))
    assert bool(jnp.all(out[0, 0] == 0.0))               # padding row stays zero

    # Large-vocab path (HBM table + async-DMA row gather), forced at demo size.
    out_gather = embedding_lookup(token_ids, weight, onehot_max_vocab=0)
    jax.block_until_ready(out_gather)
    assert bool(jnp.allclose(out_gather, ref))

    print("KERNEL_OK")
</pallas_src>

<mosaic_0001>
module attributes {stable_mosaic.version = 11 : i64} {
  func.func @_onehot_embed_kernel(%arg0: i32, %arg1: memref<8x1xi32, #tpu.memory_space<vmem>>, %arg2: memref<64x128xf32, #tpu.memory_space<vmem>>, %arg3: memref<8x128xf32, #tpu.memory_space<vmem>>) attributes {dimension_semantics = [#tpu.dimension_semantics<parallel>], iteration_bounds = array<i64: 2>, scalar_prefetch = 0 : i64, scratch_operands = 0 : i64, tpu.core_type = #tpu.core_type<tc>, window_params = [{transform_indices = @transform_0, window_bounds = array<i64: 8, 1>}, {pipeline_mode = #tpu.pipeline_mode<synchronous>, transform_indices = @transform_1, window_bounds = array<i64: 64, 128>}, {transform_indices = @transform_2, window_bounds = array<i64: 8, 128>}]} {
    %0 = tpu.iota {dimensions = array<i32: 1>} : vector<8x64xi32>
    %c0 = arith.constant 0 : index
    %c0_0 = arith.constant 0 : index
    %1 = vector.load %arg1[%c0, %c0_0] : memref<8x1xi32, #tpu.memory_space<vmem>>, vector<8x1xi32>
    %2 = vector.broadcast %1 : vector<8x1xi32> to vector<8x64xi32>
    %3 = arith.cmpi eq, %2, %0 : vector<8x64xi32>
    %4 = arith.extui %3 : vector<8x64xi1> to vector<8x64xi32>
    %5 = arith.sitofp %4 : vector<8x64xi32> to vector<8x64xf32>
    %c0_1 = arith.constant 0 : index
    %c0_2 = arith.constant 0 : index
    %6 = vector.load %arg2[%c0_1, %c0_2] : memref<64x128xf32, #tpu.memory_space<vmem>>, vector<64x128xf32>
    %cst = arith.constant dense<0.000000e+00> : vector<8x128xf32>
    %7 = tpu.matmul %5, %6, %cst {dimension_numbers = #tpu.dot_dimension_numbers<[1], [0], [0], [1], [0, 0, 1, 1], [], []>} : vector<8x64xf32>, vector<64x128xf32>, vector<8x128xf32> -> vector<8x128xf32>
    %c0_3 = arith.constant 0 : index
    %c0_4 = arith.constant 0 : index
    %8 = vector.load %arg3[%c0_3, %c0_4] : memref<8x128xf32, #tpu.memory_space<vmem>>, vector<8x128xf32>
    tpu.vector_store %arg3[%c0_3, %c0_4], %7 {strides = array<i32>} : memref<8x128xf32, #tpu.memory_space<vmem>>, vector<8x128xf32>,
    return
  }
  func.func @transform_0(%arg0: i32) -> (i32, i32) {
    %c0_i32 = arith.constant 0 : i32
    %c0_i32_0 = arith.constant 0 : i32
    return %arg0, %c0_i32 : i32, i32
  }
  func.func @transform_1(%arg0: i32) -> (i32, i32) {
    %c0_i32 = arith.constant 0 : i32
    %c0_i32_0 = arith.constant 0 : i32
    %c0_i32_1 = arith.constant 0 : i32
    return %c0_i32, %c0_i32_0 : i32, i32
  }
  func.func @transform_2(%arg0: i32) -> (i32, i32) {
    %c0_i32 = arith.constant 0 : i32
    %c0_i32_0 = arith.constant 0 : i32
    return %arg0, %c0_i32 : i32, i32
  }
}

</mosaic_0001>

<bundles_post_ra>
// kernel: tpu_custom_call.1
= control target key start
LH: loop header
LB: loop body
LE: loop exit
PB: predicated region body
PF: predicated region fallthrough
CT: control target
= control target key end

     0   :  { %7 = vsyncpa [#allocation3], 0  ;;  %s660_s0 = inlined_call_operand.vmem [shape: s32[16,1], index: 0, kind: input, shape index: {}]   ;;  %s661_s1 = inlined_call_operand.hbm [shape: f32[64,128], index: 1, kind: input, shape index: {}]   ;;  %s662_s2 = inlined_call_operand.hbm [shape: f32[16,128], index: 2, kind: output, shape index: {}]  }
   0x1   :  { %8 = vsyncpa [#allocation4], 0 }
   0x2   :  { %10 = vsyncpa [#allocation4 + $0x1], 0  ;;  %s543_s9 = smov 0   ;;  %s545_s10 = smov 0  }
   0x3   :  { %s547_s11 = smov 0   ;;  %s549_s12 = smov 0  }
   0x4 LB: > { %s564_s13 = sadd.s32 4294967295, %s519_s12   ;;  %s331_s14 = sadd.s32 4294967294, %s519_s12   ;;  %s519_s12 = sphi %s549_s12, %s670_s12   ;;  %s515_s11 = sphi %s547_s11, %s669_s11   ;;  %s511_s10 = sphi %s545_s10, %s668_s10   ;;  %s507_s9 = sphi %s543_s9, %s667_s9  }
   0x5   : > { %s568_s15 = sadd.s32 1, %s519_s12   ;;  %s70_s16 = sadd.s32 1, %s515_s11 }
   0x6   : > { %s67_s17 = ssub.s32 %s519_s12, %s568_s15  ;;  %p80_p0 = scmp.ne.s32.totalorder %s515_s11, %s511_s10 }
   0x7   : > { %p68_p1 = scmp.eq.s32.totalorder %s67_s17, 0  ;;  %p81_p2 = scmp.eq.s32.totalorder %s564_s13, 1 }
   0x8   : > { %p86_p3 = scmp.ne.s32.totalorder %s511_s10, %s507_s9  ;;  %p87_p4 = scmp.eq.s32.totalorder %s331_s14, 1 }
   0x9   : > { %s579_s18 = scalar_select %p68_p1, %s515_s11, %s70_s16  }
   0xa   : > { %p581_p5 = por %p81_p2, %p80_p0  ;;  %p585_p6 = por %p87_p4, %p86_p3 }
   0xb   : > { %p332_p7 = scmp.ge.s32.totalorder %s519_s12, 1  ;;  %p94_p8 = scmp.lt.s32.totalorder %s519_s12, 3 }
   0xc   : > { %s664_s20 = scalar_select %p585_p6, 1, 0 }
   0xd   : > { %p387_p9 = scmp.eq.s32.totalorder %s564_s13, 0  ;;  %p592_p10 = pnand %p332_p7, %p94_p8 }
   0xe   : > { %s521_s22 = smov [#allocation2]  }
   0xf   : > { %s106_s23 = sshll.u32 %s521_s22, 4  ;;  %p379_p11 = pneg %p592_p10  ;;  %s107_s23 = int_to_ptr.vmem [resolvable:$true] %s106_s23 }
  0x10   : > { %s440_s24 = scalar_lea.vmem %s107_s23, 1024  ;;  %p448_p3 = scmp.lt.s32.totalorder %s107_s23, %s107_s23 }
  0x11   : > { %p380_p12 = pnand %p387_p9, %p379_p11  ;;  %p441_p0 = scmp.ne.s32.totalorder %s107_s23, %s440_s24 }
  0x12   : > { %p449_p4 = scmp.lt.s32.totalorder %s440_s24, %s440_s24 }
  0x13   : > { %p431_p13 = pneg %p380_p12 }
  0x14   : > { %p450_p6 = por %p449_p4, %p448_p3 }
  0x15   : > { %p443_p1 = pnand %p441_p0, %p431_p13 }
  0x17   : > { %p444_p2 = pneg %p443_p1 }
  0x19   : > { %p451_p7 = pnand %p450_p6, %p444_p2 }
  0x1b   : > { %454 = shalt.err (!%p451_p7)
}
  0x1c   : > { %s522_s25 = smov 128   ;;  %s523_s26 = smov 8  }
  0x1d   : > { %382 = dma.hbm_to_vmem [thread:$0]  (!%p380_p12), %s661_s1, 1024, %s107_s23, [#allocation3], %s522_s25, %s522_s25, %s523_s26  }
  0x1e   : > { %129 = sbr.rel (%p592_p10) target bundleno = 376 (0x178), region = 28 }
  0x23   : > { %498 = dma.done.wait (%p387_p9), [#allocation3], 1024  }
  0x24   : > { %500 = vsyncadd (%p387_p9), [#allocation3], 4294966272  ;;  %p150_p8 = scmp.lt.s32.totalorder %s564_s13, 1  ;;  %v524_v0 = vmov 0   ;;  %v525_v1 = vmov 0.0   ;;  %vm526_vm0 = vmmov 0   ;;  %v154_v11 = vlaneseq }
  0x25   : > { %428 = vset.pattern.permute.xlu0 %v524_v0  ;;  %354 = vmatprep.subr.mxu0 %v525_v1  ;;  %v170_v3 = vld [vmem:[#allocation2 + $0x38] sm:$0xff]  ;;  %v169_v4 = vld [vmem:[#allocation2 + $0x30] sm:$0xff]  ;;  %v168_v5 = vld [vmem:[#allocation2 + $0x28] sm:$0xff]  ;;  %vm171_vm1 = vcmask 523264   ;;  %s147_s6 = sand.u32 1, %s511_s10   ;;  %s342_s16 = sshll.u32 %s564_s13, 7 }
  0x26   : > { %s151_s29 = scalar_select %p150_p8, %s564_s13, 1  ;;  %370 = vmatprep.mubr.msk.f32.mxu0 %vm526_vm0, %v525_v1  ;;  %355 = vmatpush3.msra.mxu0 %v170_v3  ;;  %v167_v6 = vld [vmem:[#allocation2 + $0x20] sm:$0xff]  ;;  %v166_v7 = vld [vmem:[#allocation2 + $0x18] sm:$0xff]  ;;  %v165_v8 = vld [vmem:[#allocation2 + $0x10] sm:$0xff]  ;;  %v155_v12 = vand.u32 127, %v154_v11 }
  0x27   : > { %356 = vmatprep.subr.mxu0 %v525_v1  ;;  %v164_v9 = vld [vmem:[#allocation2 + $0x8] sm:$0xff]  ;;  %v163_v10 = vld [vmem:[#allocation2] sm:$0xff]  ;;  %s337_s7 = sshll.u32 %s147_s6, 3  ;;  %s621_s22 = scalar_lea.hbm %s662_s2, %s342_s16 }
  0x28   : > { %s338_s30 = sshll.u32 %s151_s29, 3  ;;  %357 = vmatpush3.msra.mxu0 %v169_v4  ;;  %s149_s8 = scalar_lea.vmem [#allocation5], %s337_s7 }
  0x29   : > { %s153_s5 = scalar_lea.vmem %s660_s0, %s338_s30  ;;  %358 = vmatprep.subr.mxu0 %v525_v1  ;;  %s260_s14 = sshll.u32 %s149_s8, 4  ;;  %s616_s14 = int_to_ptr.vmem [resolvable:$true] %s260_s14 }
  0x2a   : > { %v156_v2 = vld [vmem:[%s153_s5] sm:$0xff]  ;;  %359 = vmatpush3.msra.mxu0 %v168_v5  ;;  %s247_s23 = scalar_lea.sflag [#allocation4], %s147_s6  ;;  %s455_s24 = scalar_lea.vmem %s616_s14, 128 }
  0x2b   : > { %158 = vperm.xlu0 %428, %v156_v2   ;;  %360 = vmatprep.subr.mxu0 %v525_v1  ;;  %p456_p6 = scmp.ne.s32.totalorder %s616_s14, %s455_s24  ;;  %s527_s13 = smov [#allocation5]  }
  0x2c   : > { %361 = vmatpush3.msra.mxu0 %v167_v6  ;;  %s459_s25 = sshll.u32 %s527_s13, 4  ;;  %s460_s25 = int_to_ptr.vmem [resolvable:$false] %s459_s25 }
  0x2d   : > { %362 = vmatprep.subr.mxu0 %v525_v1  ;;  %p457_p9 = pnand %p456_p6, %p581_p5  ;;  %s461_s26 = scalar_lea.vmem %s460_s25, 256 }
  0x2e   : > { %363 = vmatpush3.msra.mxu0 %v166_v7  ;;  %p462_p11 = scmp.lt.s32.totalorder %s616_s14, %s460_s25  ;;  %p463_p12 = scmp.lt.s32.totalorder %s461_s26, %s455_s24 }
  0x2f   : > { %364 = vmatprep.subr.mxu0 %v525_v1  ;;  %p458_p10 = pneg %p457_p9 }
  0x30   : > { %365 = vmatpush3.msra.mxu0 %v165_v8  ;;  %p464_p13 = por %p463_p12, %p462_p11 }
  0x31   : > { %366 = vmatprep.subr.mxu0 %v525_v1 }
  0x32   : > { %367 = vmatpush3.msra.mxu0 %v164_v9  ;;  %p465_p0 = pnand %p464_p13, %p458_p10 }
  0x33   : > { %368 = vmatprep.subr.mxu0 %v525_v1 }
  0x34   : > { %369 = vmatpush3.msra.mxu0 %v163_v10 }
  0xa6   : > { %v159_v13 = vpop.permute.xlu0 %158 }
  0xa7   : > { %vm160_vm2 = vcmp.eq.s32.totalorder %v159_v13, %v155_v12 }
  0xa8   : > { %v339_v14 = vsel %vm160_vm2, 1.0, %v525_v1 }
  0xa9   : > { %371 = vmatmul.mubr.msk.f32.vlgmr.msra.gmra.mxu0 %vm171_vm1, %v339_v14 }
 0x169   : > { %v241_v15 = vpop.f32.mrf.mxu0 }
 0x16a   : > { %245 = vst [vmem:[%s149_s8] sm:$0xff] %v241_v15 }
 0x16b   : > { %v372_v16 = vpop.f32.mrf.mxu0 }
 0x16c   : > { %468 = shalt.err (!%p465_p0)
}
 0x16d   : > { %s469_s27 = scalar_lea.hbm %s621_s22, 128  ;;  %s473_s30 = scalar_lea.hbm %s662_s2, 256 }
 0x16e   : > { %p470_p1 = scmp.ne.s32.totalorder %s621_s22, %s469_s27  ;;  %p474_p4 = scmp.lt.s32.totalorder %s621_s22, %s662_s2 }
 0x16f   : > { %p475_p7 = scmp.lt.s32.totalorder %s473_s30, %s469_s27 }
 0x170   : > { %p471_p2 = pnand %p470_p1, %p581_p5 }
 0x171   : > { %p476_p8 = por %p475_p7, %p474_p4 }
 0x172   : > { %p472_p3 = pneg %p471_p2 }
 0x174   : > { %p477_p6 = pnand %p476_p8, %p472_p3 }
 0x176   : > { %480 = shalt.err (!%p477_p6)
}
 0x177   : > { %377 = dma.vmem_to_hbm [thread:$0]  (%p581_p5), %s616_s14, 128, %s621_s22, %s247_s23  }
 0x178 PF: > { %p389_p9 = scmp.ge.s32.totalorder %s519_s12, 2  ;;  %s272_s5 = sand.u32 1, %s507_s9  }
 0x179   : > { %p666_p10 = scmp.ne.s32.totalorder %s664_s20, 0  ;;  %s273_s6 = scalar_lea.sflag [#allocation4], %s272_s5 }
 0x17b   : > { %p384_p11 = pnand %p389_p9, %p666_p10 }
 0x17d   : > { %p385_p12 = pneg %p384_p11 }
 0x17f   : > { %502 = dma.done.wait (%p385_p12), %s273_s6, 128  }
 0x180   : > { %504 = vsyncadd (%p385_p12), %s273_s6, 4294967168  ;;  %p13_p13 = scmp.ge.s32.totalorder %s568_s15, 4   ;;  %s667_s9 = smov %s511_s10 }
 0x181   : > { %s668_s10 = smov %s515_s11  ;;  %s669_s11 = smov %s579_s18 }
 0x182   : > { %s670_s12 = smov %s568_s15  ;;  %15 = sbr.rel (!%p13_p13) target bundleno = 4 (0x4), region = 68 }
 0x187   :  { %278 = vsyncpa [#allocation3], 1 }
 0x188   :  { %280 = vsyncpa [#allocation3 + $0x1], 1 }
 0x189   :  { %281 = vsyncpa [#allocation4], 1 }
 0x18a   :  { %283 = vsyncpa [#allocation4 + $0x1], 1 }

</bundles_post_ra>
